<compile_context>
chip_gen: v6e
topology: v6e:2x2x1
jax: 0.10.0
libtpu: 0.0.40
codegen_flags: <defaults>
</compile_context>

<pallas_src>
import functools
import math

import jax
import jax.numpy as jnp
from jax import lax
from jax.experimental import pallas as pl
from jax.experimental.pallas import tpu as pltpu


def _round_up(a, b):
    return -(-a // b) * b


def _sublane(dtype):
    # Native sublane packing: 8 rows for 32-bit, 16 for 16-bit, 32 for 8-bit.
    return max(8, 32 // jnp.dtype(dtype).itemsize)


def _vmem_limit_and_budget():
    # v5e/v6e: 128 MiB physical VMEM, v7x: 64 MiB.  Use ~3/4 as the scoped
    # limit and ~1/8 of the limit as the per-input-block working-set target
    # (double buffering + intermediates leave plenty of headroom).
    try:
        cap = int(pltpu.get_tpu_info().vmem_capacity_bytes)
    except Exception:
        cap = 64 * 1024 * 1024
    limit = min((cap * 3) // 4, 96 * 1024 * 1024)
    return limit, limit // 8


def _pick_rows_block(rows, row_bytes, sublane, budget):
    """Row-tile size: fits the VMEM budget, aims for >= 4 grid steps, and
    prefers an exact divisor of `rows` so no ragged boundary block (and no
    wrapper-side padding copy) is ever needed."""
    if rows <= sublane:
        return rows                                   # full-dim block (legal)
    fit = max(sublane, (budget // max(row_bytes, 1)) // sublane * sublane)
    quarter = max(sublane, (rows // 4) // sublane * sublane)
    cap = max(sublane, min(fit, quarter))
    if rows % sublane == 0:
        r = rows // sublane
        for m in range(min(cap // sublane, r), 0, -1):
            if r % m == 0:
                return m * sublane                    # exact division
    if rows * row_bytes <= budget:
        return rows                                   # full-dim block
    # TODO(synk): rare case (rows not a multiple of the sublane and too big for
    # one block) relies on Pallas boundary clipping of the last row tile.
    return cap


# ---------------------------------------------------------------------------
# Lane-dense fold kernel (divisible case, small bin width w):
#   x_ref: (RM, C) with C = k*w a multiple of 128; each row holds k whole
#          pooling bins laid out contiguously.
#   o_ref: (RM, k) bin maxima.
# ---------------------------------------------------------------------------
def _fold_max_kernel(x_ref, o_ref):
    C = x_ref.shape[-1]
    k = o_ref.shape[-1]
    w = C // k

    y = x_ref[...].astype(jnp.float32)

    # Window-max tree on the XLU: afterwards lane b*w of every row holds
    # max(x[b*w : (b+1)*w]).  pltpu.roll == np.roll, so roll by (C - s) brings
    # lane (i + s) to lane i.  Works for any (non power-of-two) w.
    cover = 1
    while cover < w:
        s = min(cover, w - cover)
        y = jnp.maximum(y, pltpu.roll(y, shift=C - s, axis=1))
        cover += s

    # Compact lanes {0, w, 2w, ...} -> {0..k-1}.  A lane-strided gather has no
    # cheap TPU lowering, so use the otherwise-idle MXU with a 0/1 selection
    # matrix.  Gathering each byte of the f32 bit pattern separately keeps the
    # result bit-exact regardless of the MXU's matmul precision mode.
    ii = lax.broadcasted_iota(jnp.int32, (C, k), 0)
    bb = lax.broadcasted_iota(jnp.int32, (C, k), 1)
    sel = (ii == bb * w).astype(jnp.float32)

    bits = pltpu.bitcast(y, jnp.int32)
    out_bits = jnp.zeros(o_ref.shape, jnp.uint32)
    for j in range(4):
        piece = ((bits >> (8 * j)) & 0xFF).astype(jnp.float32)
        g = jnp.dot(piece, sel, preferred_element_type=jnp.float32)
        g = g.astype(jnp.int32).astype(jnp.uint32) << (8 * j)
        out_bits = out_bits | g
    o_ref[...] = pltpu.bitcast(out_bits, jnp.float32).astype(o_ref.dtype)
    # TODO(synk): +/-inf inputs round-trip exactly here, but a single
    # precision=HIGHEST f32 matmul could replace the 4 byte-gathers if exact.


def _call_fold(xr, k, vmem_limit, budget):
    rows, C = xr.shape
    dtype = xr.dtype
    row_bytes = C * jnp.dtype(dtype).itemsize
    rm = _pick_rows_block(rows, row_bytes, _sublane(dtype), budget)
    return pl.pallas_call(
        _fold_max_kernel,
        out_shape=jax.ShapeDtypeStruct((rows, k), dtype),
        grid=(pl.cdiv(rows, rm),),
        in_specs=[pl.BlockSpec((rm, C), lambda i: (i, 0))],
        out_specs=pl.BlockSpec((rm, k), lambda i: (i, 0)),
        compiler_params=pltpu.CompilerParams(
            dimension_semantics=("parallel",),
            vmem_limit_bytes=vmem_limit),
    )(xr)


# ---------------------------------------------------------------------------
# Mask-based segmented max (general / wide-bin case), lane-chunked:
#   x_ref: (RM, TL) lane chunk c of each row; o_ref: (RM, S) running max,
#   resident in VMEM across the lane-chunk grid axis.
# ---------------------------------------------------------------------------
def _segmented_max_kernel(x_ref, o_ref, *, bins, lane_chunk):
    c = pl.program_id(1)

    @pl.when(c == 0)
    def _init():
        o_ref[...] = jnp.full(o_ref.shape, -jnp.inf, o_ref.dtype)

    x = x_ref[...]
    lane = lax.broadcasted_iota(jnp.int32, x.shape, 1) + c * lane_chunk
    cols = []
    for a, b in bins:
        m = (lane >= a) & (lane < b)
        cols.append(jnp.max(jnp.where(m, x, -jnp.inf), axis=-1, keepdims=True))
    upd = cols[0] if len(cols) == 1 else jnp.concatenate(cols, axis=-1)
    o_ref[...] = jnp.maximum(o_ref[...], upd.astype(o_ref.dtype))


def _call_segmented(x2d, bins, vmem_limit, budget, max_lane_block):
    rows, L = x2d.shape
    S = len(bins)
    dtype = x2d.dtype
    itemsize = jnp.dtype(dtype).itemsize
    sub = _sublane(dtype)

    lane_cap = max(128, budget // (sub * itemsize))
    if max_lane_block is not None:
        lane_cap = max(128, min(lane_cap, max_lane_block))
    if L <= lane_cap:
        tl, n_chunks = L, 1
    else:
        tl = (lane_cap // 128) * 128
        n_chunks = pl.cdiv(L, tl)

    row_bytes = _round_up(tl, 128) * itemsize
    rm = _pick_rows_block(rows, row_bytes, sub, budget)
    kernel = functools.partial(_segmented_max_kernel,
                               bins=tuple(bins), lane_chunk=tl)
    return pl.pallas_call(
        kernel,
        out_shape=jax.ShapeDtypeStruct((rows, S), dtype),
        grid=(pl.cdiv(rows, rm), n_chunks),
        in_specs=[pl.BlockSpec((rm, tl), lambda i, c: (i, c))],
        out_specs=pl.BlockSpec((rm, S), lambda i, c: (i, 0)),
        compiler_params=pltpu.CompilerParams(
            dimension_semantics=("parallel", "arbitrary"),
            vmem_limit_bytes=vmem_limit),
    )(x2d)


@functools.partial(jax.jit, static_argnums=(1,),
                   static_argnames=("_max_lane_block",))
def text_spp(x, size, *, _max_lane_block=None):
    """TextSPP.forward == AdaptiveMaxPool1d(size): (N, C, L) -> (N, C, size)."""
    N, Ch, L = x.shape
    S = int(size)
    vmem_limit, budget = _vmem_limit_and_budget()

    if L % S == 0:
        w = L // S
        if w == 1:
            return x                                   # identity pooling
        if w < 64:
            # Lane-dense fold: pack k whole bins per kernel row so the HBM DMA,
            # the VMEM tiles and the vregs are dense even for tiny bin widths.
            C_lanes = (128 // math.gcd(w, 128)) * w    # lcm(w, 128)
            k = C_lanes // w
            if C_lanes <= 2048 and (N * Ch * S) % k == 0:
                xr = x.reshape(-1, C_lanes)            # free, contiguous
                out = _call_fold(xr, k, vmem_limit,
                                 min(budget, 2 * 1024 * 1024))
                return out.reshape(N, Ch, S)
        # Wide bins (w >= 64) or a fold factor that does not divide N*C*S:
        # one bin per row, lane-chunked running max for very large w.
        xr = x.reshape(N * Ch * S, w)
        out = _call_segmented(xr, [(0, w)], vmem_limit, budget, _max_lane_block)
        return out.reshape(N, Ch, S)

    # Non-divisible: PyTorch adaptive bins overlap / are ragged -> mask-based
    # segmented max with static (floor/ceil) bin boundaries.
    bins = [((b * L) // S, -(-((b + 1) * L) // S)) for b in range(S)]
    x2d = x.reshape(N * Ch, L)
    out = _call_segmented(x2d, bins, vmem_limit, budget, _max_lane_block)
    return out.reshape(N, Ch, S)


def _ref_text_spp(x, S):
    # Pure-JAX reference of PyTorch AdaptiveMaxPool1d (validation only).
    L = x.shape[-1]
    cols = []
    for b in range(S):
        a = (b * L) // S
        e = -(-((b + 1) * L) // S)
        cols.append(jnp.max(x[..., a:e], axis=-1))
    return jnp.stack(cols, axis=-1)


if __name__ == "__main__":
    keys = jax.random.split(jax.random.PRNGKey(0), 8)

    def check(x, size, **kw):
        y = text_spp(x, size, **kw)
        jax.block_until_ready(y)
        ref = _ref_text_spp(x, size)
        assert y.shape == ref.shape and y.dtype == x.dtype, (y.shape, y.dtype)
        assert jnp.array_equal(y, ref), f"mismatch: size={size} shape={x.shape}"

    # Module-default size=128, w=8: lane-dense fold path, multi-step row grid.
    check(jax.random.normal(keys[0], (2, 4, 1024), dtype=jnp.float32), 128)
    # Same path in bfloat16 (results are bit-exact in the input dtype).
    check(jax.random.normal(keys[1], (2, 4, 1024), dtype=jnp.bfloat16), 128)
    # Small divisible case (w=8): single-block fold.
    check(jax.random.normal(keys[2], (2, 4, 64), dtype=jnp.float32), 8)
    # Odd bin width (w=5): non-power-of-two window tree, k=128 selection.
    check(jax.random.normal(keys[3], (2, 3, 640), dtype=jnp.float32), 128)
    # Wide bins (w=256 >= 64): one-bin-per-row path, 2 exact lane chunks.
    check(jax.random.normal(keys[4], (2, 4, 512), dtype=jnp.float32), 2,
          _max_lane_block=128)
    # Non-divisible (overlapping PyTorch bins), single lane chunk.
    check(jax.random.normal(keys[5], (2, 4, 20), dtype=jnp.float32), 8)
    # Non-divisible, multi-chunk running-max accumulation (3 exact chunks).
    check(jax.random.normal(keys[6], (2, 2, 384), dtype=jnp.float32), 7,
          _max_lane_block=128)
    # Fold-divisibility fallback (N*C*S not divisible by the fold factor).
    check(jax.random.normal(keys[7], (1, 3, 24), dtype=jnp.float32), 12)

    print("KERNEL_OK")
</pallas_src>

<mosaic_0001>
module attributes {stable_mosaic.version = 11 : i64} {
  func.func @_fold_max_kernel(%arg0: i32, %arg1: memref<16x128xf32, #tpu.memory_space<vmem>>, %arg2: memref<16x16xf32, #tpu.memory_space<vmem>>) attributes {dimension_semantics = [#tpu.dimension_semantics<parallel>], iteration_bounds = array<i64: 4>, scalar_prefetch = 0 : i64, scratch_operands = 0 : i64, tpu.core_type = #tpu.core_type<tc>, window_params = [{transform_indices = @transform_0, window_bounds = array<i64: 16, 128>}, {transform_indices = @transform_1, window_bounds = array<i64: 16, 16>}]} {
    %c0 = arith.constant 0 : index
    %c0_0 = arith.constant 0 : index
    %0 = vector.load %arg1[%c0, %c0_0] : memref<16x128xf32, #tpu.memory_space<vmem>>, vector<16x128xf32>
    %c127_i32 = arith.constant 127 : i32
    %1 = tpu.dynamic_rotate %0 by %c127_i32 dim 1 : vector<16x128xf32>, i32 -> vector<16x128xf32>
    %2 = arith.maximumf %0, %1 : vector<16x128xf32>
    %c126_i32 = arith.constant 126 : i32
    %3 = tpu.dynamic_rotate %2 by %c126_i32 dim 1 : vector<16x128xf32>, i32 -> vector<16x128xf32>
    %4 = arith.maximumf %2, %3 : vector<16x128xf32>
    %c124_i32 = arith.constant 124 : i32
    %5 = tpu.dynamic_rotate %4 by %c124_i32 dim 1 : vector<16x128xf32>, i32 -> vector<16x128xf32>
    %6 = arith.maximumf %4, %5 : vector<16x128xf32>
    %7 = tpu.iota {dimensions = array<i32: 0>} : vector<128x16xi32>
    %8 = tpu.iota {dimensions = array<i32: 1>} : vector<128x16xi32>
    %c8_i32 = arith.constant 8 : i32
    %9 = vector.broadcast %c8_i32 : i32 to vector<128x16xi32>
    %10 = arith.muli %8, %9 : vector<128x16xi32>
    %11 = arith.cmpi eq, %7, %10 : vector<128x16xi32>
    %12 = arith.extui %11 : vector<128x16xi1> to vector<128x16xi32>
    %13 = arith.sitofp %12 : vector<128x16xi32> to vector<128x16xf32>
    %14 = tpu.bitcast %6 : vector<16x128xf32> -> vector<16x128xi32>
    %c0_i32 = arith.constant 0 : i32
    %15 = vector.broadcast %c0_i32 : i32 to vector<16x16xi32>
    %c0_i32_1 = arith.constant 0 : i32
    %16 = vector.broadcast %c0_i32_1 : i32 to vector<16x128xi32>
    %17 = arith.shrsi %14, %16 : vector<16x128xi32>
    %c255_i32 = arith.constant 255 : i32
    %18 = vector.broadcast %c255_i32 : i32 to vector<16x128xi32>
    %19 = arith.andi %17, %18 : vector<16x128xi32>
    %20 = arith.sitofp %19 : vector<16x128xi32> to vector<16x128xf32>
    %cst = arith.constant dense<0.000000e+00> : vector<16x16xf32>
    %21 = tpu.matmul %20, %13, %cst {dimension_numbers = #tpu.dot_dimension_numbers<[1], [0], [0], [1], [0, 0, 1, 1], [], []>} : vector<16x128xf32>, vector<128x16xf32>, vector<16x16xf32> -> vector<16x16xf32>
    %22 = arith.fptosi %21 : vector<16x16xf32> to vector<16x16xi32>
    %c0_i32_2 = arith.constant 0 : i32
    %23 = vector.broadcast %c0_i32_2 : i32 to vector<16x16xi32>
    %24 = arith.shli %22, %23 : vector<16x16xi32>
    %25 = arith.ori %15, %24 : vector<16x16xi32>
    %c8_i32_3 = arith.constant 8 : i32
    %26 = vector.broadcast %c8_i32_3 : i32 to vector<16x128xi32>
    %27 = arith.shrsi %14, %26 : vector<16x128xi32>
    %c255_i32_4 = arith.constant 255 : i32
    %28 = vector.broadcast %c255_i32_4 : i32 to vector<16x128xi32>
    %29 = arith.andi %27, %28 : vector<16x128xi32>
    %30 = arith.sitofp %29 : vector<16x128xi32> to vector<16x128xf32>
    %cst_5 = arith.constant dense<0.000000e+00> : vector<16x16xf32>
    %31 = tpu.matmul %30, %13, %cst_5 {dimension_numbers = #tpu.dot_dimension_numbers<[1], [0], [0], [1], [0, 0, 1, 1], [], []>} : vector<16x128xf32>, vector<128x16xf32>, vector<16x16xf32> -> vector<16x16xf32>
    %32 = arith.fptosi %31 : vector<16x16xf32> to vector<16x16xi32>
    %c8_i32_6 = arith.constant 8 : i32
    %33 = vector.broadcast %c8_i32_6 : i32 to vector<16x16xi32>
    %34 = arith.shli %32, %33 : vector<16x16xi32>
    %35 = arith.ori %25, %34 : vector<16x16xi32>
    %c16_i32 = arith.constant 16 : i32
    %36 = vector.broadcast %c16_i32 : i32 to vector<16x128xi32>
    %37 = arith.shrsi %14, %36 : vector<16x128xi32>
    %c255_i32_7 = arith.constant 255 : i32
    %38 = vector.broadcast %c255_i32_7 : i32 to vector<16x128xi32>
    %39 = arith.andi %37, %38 : vector<16x128xi32>
    %40 = arith.sitofp %39 : vector<16x128xi32> to vector<16x128xf32>
    %cst_8 = arith.constant dense<0.000000e+00> : vector<16x16xf32>
    %41 = tpu.matmul %40, %13, %cst_8 {dimension_numbers = #tpu.dot_dimension_numbers<[1], [0], [0], [1], [0, 0, 1, 1], [], []>} : vector<16x128xf32>, vector<128x16xf32>, vector<16x16xf32> -> vector<16x16xf32>
    %42 = arith.fptosi %41 : vector<16x16xf32> to vector<16x16xi32>
    %c16_i32_9 = arith.constant 16 : i32
    %43 = vector.broadcast %c16_i32_9 : i32 to vector<16x16xi32>
    %44 = arith.shli %42, %43 : vector<16x16xi32>
    %45 = arith.ori %35, %44 : vector<16x16xi32>
    %c24_i32 = arith.constant 24 : i32
    %46 = vector.broadcast %c24_i32 : i32 to vector<16x128xi32>
    %47 = arith.shrsi %14, %46 : vector<16x128xi32>
    %c255_i32_10 = arith.constant 255 : i32
    %48 = vector.broadcast %c255_i32_10 : i32 to vector<16x128xi32>
    %49 = arith.andi %47, %48 : vector<16x128xi32>
    %50 = arith.sitofp %49 : vector<16x128xi32> to vector<16x128xf32>
    %cst_11 = arith.constant dense<0.000000e+00> : vector<16x16xf32>
    %51 = tpu.matmul %50, %13, %cst_11 {dimension_numbers = #tpu.dot_dimension_numbers<[1], [0], [0], [1], [0, 0, 1, 1], [], []>} : vector<16x128xf32>, vector<128x16xf32>, vector<16x16xf32> -> vector<16x16xf32>
    %52 = arith.fptosi %51 : vector<16x16xf32> to vector<16x16xi32>
    %c24_i32_12 = arith.constant 24 : i32
    %53 = vector.broadcast %c24_i32_12 : i32 to vector<16x16xi32>
    %54 = arith.shli %52, %53 : vector<16x16xi32>
    %55 = arith.ori %45, %54 : vector<16x16xi32>
    %56 = tpu.bitcast %55 : vector<16x16xi32> -> vector<16x16xf32>
    %c0_13 = arith.constant 0 : index
    %c0_14 = arith.constant 0 : index
    %57 = vector.load %arg2[%c0_13, %c0_14] : memref<16x16xf32, #tpu.memory_space<vmem>>, vector<16x16xf32>
    tpu.vector_store %arg2[%c0_13, %c0_14], %56 {strides = array<i32>} : memref<16x16xf32, #tpu.memory_space<vmem>>, vector<16x16xf32>,
    return
  }
  func.func @transform_0(%arg0: i32) -> (i32, i32) {
    %c0_i32 = arith.constant 0 : i32
    %c0_i32_0 = arith.constant 0 : i32
    return %arg0, %c0_i32 : i32, i32
  }
  func.func @transform_1(%arg0: i32) -> (i32, i32) {
    %c0_i32 = arith.constant 0 : i32
    %c0_i32_0 = arith.constant 0 : i32
    return %arg0, %c0_i32 : i32, i32
  }
}

</mosaic_0001>

<bundles_post_ra>
// kernel: text_spp.1
= control target key start
LH: loop header
LB: loop body
LE: loop exit
PB: predicated region body
PF: predicated region fallthrough
CT: control target
= control target key end

     0   :  { %s968_s6 = smov 0   ;;  %s1490_s0 = inlined_call_operand.vmem [shape: f32[64,128], index: 0, kind: input, shape index: {}]   ;;  %s1491_s1 = inlined_call_operand.vmem [shape: f32[64,16], index: 1, kind: output, shape index: {}]  }
   0x1 LB: > { %s613_s7 = sadd.s32 4294967295, %s952_s6   ;;  %p617_p0 = scmp.ge.s32.totalorder %s952_s6, 1  ;;  %s952_s6 = sphi %s968_s6, %s11_s6  }
   0x2   : > { %p88_p1 = scmp.lt.s32.totalorder %s952_s6, 5 }
   0x4   : > { %p89_p2 = pnand %p617_p0, %p88_p1 }
   0x5   : > { %s618_s8 = sshll.u32 (!%p89_p2), %s613_s7, 1  ;;  %s954_s13 = smov (!%p89_p2), 127  }
   0x6   : > { %92 = sbr.rel (%p89_p2) target bundleno = 613 (0x265), region = 24  ;;  %p109_p3 = scmp.lt.s32.totalorder (!%p89_p2), %s618_s8, 7 }
   0x7   : > { %s955_s14 = smov (!%p89_p2), 126   ;;  %s957_s15 = smov (!%p89_p2), 124  }
   0xb   : > { %s1525_s8 = smov (!%p109_p3, %s618_s8), 7  ;;  %v140_v2 = vlaneseq  ;;  %v956_v14 = vmov 1.0  }
   0xc   : > { %s619_s9 = sshll.u32 %s1525_s8, 3 }
   0xd   : > { %s112_s12 = scalar_lea.vmem %s1490_s0, %s619_s9  ;;  %v984_v3 = vshrl.u32 %v140_v2, 7  ;;  %v158_v4 = vand.u32 127, %v140_v2  ;;  %s118_s18 = scalar_lea.vmem %s1491_s1, %s619_s9 }
   0xe   : > { %v120_v0 = vld [vmem:[%s112_s12] sm:$0xff]  ;;  %v121_v1 = vld [vmem:[%s112_s12 + $0x8] sm:$0xff] }
   0xf   : > { %122 = vrot.lane.b32.xlu0 %v120_v0, %s954_s13  ;;  %v156_v6 = vadd.s32 120, %v984_v3  ;;  %v987_v7 = vmul.u32 8, %v158_v4  ;;  %v155_v8 = vadd.s32 112, %v984_v3  ;;  %v154_v9 = vadd.s32 104, %v984_v3 }
  0x10   : > { %v153_v13 = vadd.s32 96, %v984_v3  ;;  %v152_v17 = vadd.s32 88, %v984_v3  ;;  %v151_v20 = vadd.s32 80, %v984_v3  ;;  %v150_v22 = vadd.s32 72, %v984_v3 }
  0x11   : > { %vm994_vm0 = vcmp.eq.s32.totalorder %v156_v6, %v987_v7  ;;  %vm999_vm1 = vcmp.eq.s32.totalorder %v155_v8, %v987_v7  ;;  %vm1015_vm2 = vcmp.eq.s32.totalorder %v154_v9, %v987_v7  ;;  %v149_v24 = vadd.s32 64, %v984_v3 }
  0x12   : > { %778 = vmatprep.subr.msk.mxu0 %vm994_vm0, %v956_v14  ;;  %813 = vmatprep.subr.msk.mxu1 %vm994_vm0, %v956_v14  ;;  %vm1035_vm3 = vcmp.eq.s32.totalorder %v153_v13, %v987_v7  ;;  %vm1051_vm4 = vcmp.eq.s32.totalorder %v152_v17, %v987_v7  ;;  %vm1069_vm5 = vcmp.eq.s32.totalorder %v151_v20, %v987_v7  ;;  %v148_v26 = vadd.s32 56, %v984_v3 }
  0x13   : > { %124 = vrot.lane.b32.xlu0 %v121_v1, %s954_s13  ;;  %779 = vmatpush3.msk.msra.mxu0 %vm994_vm0, %v956_v14  ;;  %vm1087_vm6 = vcmp.eq.s32.totalorder %v150_v22, %v987_v7  ;;  %vm1105_vm7 = vcmp.eq.s32.totalorder %v149_v24, %v987_v7  ;;  %v147_v28 = vadd.s32 48, %v984_v3  ;;  %v146_v30 = vadd.s32 40, %v984_v3 }
  0x14   : > { %780 = vmatprep.subr.msk.mxu0 %vm999_vm1, %v956_v14  ;;  %814 = vmatpush3.msk.msra.mxu1 %vm994_vm0, %v956_v14  ;;  %vm1123_vm8 = vcmp.eq.s32.totalorder %v148_v26, %v987_v7  ;;  %v145_v32 = vadd.s32 32, %v984_v3  ;;  %v144_v35 = vadd.s32 24, %v984_v3  ;;  %v143_v37 = vadd.s32 16, %v984_v3 }
  0x15   : > { %781 = vmatpush3.msk.msra.mxu0 %vm999_vm1, %v956_v14  ;;  %815 = vmatprep.subr.msk.mxu1 %vm999_vm1, %v956_v14  ;;  %vm1141_vm9 = vcmp.eq.s32.totalorder %v147_v28, %v987_v7  ;;  %vm1159_vm10 = vcmp.eq.s32.totalorder %v146_v30, %v987_v7  ;;  %v142_v39 = vadd.s32 8, %v984_v3  ;;  %vm1263_vm15 = vcmp.eq.s32.totalorder %v984_v3, %v987_v7 }
  0x16   : > { %782 = vmatprep.subr.msk.mxu0 %vm1015_vm2, %v956_v14  ;;  %816 = vmatpush3.msk.msra.mxu1 %vm999_vm1, %v956_v14  ;;  %vm1176_vm11 = vcmp.eq.s32.totalorder %v145_v32, %v987_v7  ;;  %vm1212_vm12 = vcmp.eq.s32.totalorder %v144_v35, %v987_v7  ;;  %vm1227_vm13 = vcmp.eq.s32.totalorder %v143_v37, %v987_v7 }
  0x17   : > { %783 = vmatpush3.msk.msra.mxu0 %vm1015_vm2, %v956_v14  ;;  %817 = vmatprep.subr.msk.mxu1 %vm1015_vm2, %v956_v14  ;;  %vm1245_vm14 = vcmp.eq.s32.totalorder %v142_v39, %v987_v7 }
  0x18   : > { %784 = vmatprep.subr.msk.mxu0 %vm1035_vm3, %v956_v14  ;;  %818 = vmatpush3.msk.msra.mxu1 %vm1015_vm2, %v956_v14 }
  0x19   : > { %785 = vmatpush3.msk.msra.mxu0 %vm1035_vm3, %v956_v14  ;;  %819 = vmatprep.subr.msk.mxu1 %vm1035_vm3, %v956_v14 }
  0x1a   : > { %786 = vmatprep.subr.msk.mxu0 %vm1051_vm4, %v956_v14  ;;  %820 = vmatpush3.msk.msra.mxu1 %vm1035_vm3, %v956_v14 }
  0x1b   : > { %787 = vmatpush3.msk.msra.mxu0 %vm1051_vm4, %v956_v14  ;;  %821 = vmatprep.subr.msk.mxu1 %vm1051_vm4, %v956_v14 }
  0x1c   : > { %788 = vmatprep.subr.msk.mxu0 %vm1069_vm5, %v956_v14  ;;  %822 = vmatpush3.msk.msra.mxu1 %vm1051_vm4, %v956_v14 }
  0x1d   : > { %789 = vmatpush3.msk.msra.mxu0 %vm1069_vm5, %v956_v14  ;;  %823 = vmatprep.subr.msk.mxu1 %vm1069_vm5, %v956_v14 }
  0x1e   : > { %790 = vmatprep.subr.msk.mxu0 %vm1087_vm6, %v956_v14  ;;  %824 = vmatpush3.msk.msra.mxu1 %vm1069_vm5, %v956_v14 }
  0x1f   : > { %791 = vmatpush3.msk.msra.mxu0 %vm1087_vm6, %v956_v14  ;;  %825 = vmatprep.subr.msk.mxu1 %vm1087_vm6, %v956_v14 }
  0x20   : > { %792 = vmatprep.subr.msk.mxu0 %vm1105_vm7, %v956_v14  ;;  %826 = vmatpush3.msk.msra.mxu1 %vm1087_vm6, %v956_v14 }
  0x21   : > { %793 = vmatpush3.msk.msra.mxu0 %vm1105_vm7, %v956_v14  ;;  %827 = vmatprep.subr.msk.mxu1 %vm1105_vm7, %v956_v14 }
  0x22   : > { %794 = vmatprep.subr.msk.mxu0 %vm1123_vm8, %v956_v14  ;;  %828 = vmatpush3.msk.msra.mxu1 %vm1105_vm7, %v956_v14 }
  0x23   : > { %795 = vmatpush3.msk.msra.mxu0 %vm1123_vm8, %v956_v14  ;;  %829 = vmatprep.subr.msk.mxu1 %vm1123_vm8, %v956_v14 }
  0x24   : > { %796 = vmatprep.subr.msk.mxu0 %vm1141_vm9, %v956_v14  ;;  %830 = vmatpush3.msk.msra.mxu1 %vm1123_vm8, %v956_v14 }
  0x25   : > { %797 = vmatpush3.msk.msra.mxu0 %vm1141_vm9, %v956_v14  ;;  %831 = vmatprep.subr.msk.mxu1 %vm1141_vm9, %v956_v14 }
  0x26   : > { %798 = vmatprep.subr.msk.mxu0 %vm1159_vm10, %v956_v14  ;;  %832 = vmatpush3.msk.msra.mxu1 %vm1141_vm9, %v956_v14 }
  0x27   : > { %799 = vmatpush3.msk.msra.mxu0 %vm1159_vm10, %v956_v14  ;;  %833 = vmatprep.subr.msk.mxu1 %vm1159_vm10, %v956_v14 }
  0x28   : > { %800 = vmatprep.subr.msk.mxu0 %vm1176_vm11, %v956_v14  ;;  %834 = vmatpush3.msk.msra.mxu1 %vm1159_vm10, %v956_v14 }
  0x29   : > { %801 = vmatpush3.msk.msra.mxu0 %vm1176_vm11, %v956_v14  ;;  %835 = vmatprep.subr.msk.mxu1 %vm1176_vm11, %v956_v14 }
  0x2a   : > { %836 = vmatpush3.msk.msra.mxu1 %vm1176_vm11, %v956_v14  ;;  %802 = vmatprep.subr.msk.mxu0 %vm1212_vm12, %v956_v14 }
  0x2b   : > { %837 = vmatprep.subr.msk.mxu1 %vm1212_vm12, %v956_v14  ;;  %803 = vmatpush3.msk.msra.mxu0 %vm1212_vm12, %v956_v14 }
  0x2c   : > { %838 = vmatpush3.msk.msra.mxu1 %vm1212_vm12, %v956_v14  ;;  %804 = vmatprep.subr.msk.mxu0 %vm1227_vm13, %v956_v14 }
  0x2d   : > { %839 = vmatprep.subr.msk.mxu1 %vm1227_vm13, %v956_v14  ;;  %805 = vmatpush3.msk.msra.mxu0 %vm1227_vm13, %v956_v14 }
  0x2e   : > { %840 = vmatpush3.msk.msra.mxu1 %vm1227_vm13, %v956_v14  ;;  %806 = vmatprep.subr.msk.mxu0 %vm1245_vm14, %v956_v14 }
  0x2f   : > { %841 = vmatprep.subr.msk.mxu1 %vm1245_vm14, %v956_v14  ;;  %807 = vmatpush3.msk.msra.mxu0 %vm1245_vm14, %v956_v14 }
  0x30   : > { %842 = vmatpush3.msk.msra.mxu1 %vm1245_vm14, %v956_v14  ;;  %808 = vmatprep.subr.msk.mxu0 %vm1263_vm15, %v956_v14 }
  0x31   : > { %843 = vmatprep.subr.msk.mxu1 %vm1263_vm15, %v956_v14  ;;  %809 = vmatpush3.msk.msra.mxu0 %vm1263_vm15, %v956_v14 }
  0x32   : > { %844 = vmatpush3.msk.msra.mxu1 %vm1263_vm15, %v956_v14  ;;  %848 = vmatprep.subr.msk.mxu0 %vm994_vm0, %v956_v14 }
  0x33   : > { %883 = vmatprep.subr.msk.mxu1 %vm994_vm0, %v956_v14 }
  0x81   : > { %v123_v5 = vpop.permute.xlu0 %122 }
  0x82   : > { %v991_v10 = vmax.f32 %v120_v0, %v123_v5 }
  0x84   : > { %128 = vrot.lane.b32.xlu1 %v991_v10, %s955_s14 }
  0x85   : > { %v125_v15 = vpop.permute.xlu0 %124 }
  0x86   : > { %v1020_v18 = vmax.f32 %v121_v1, %v125_v15 }
  0x88   : > { %130 = vrot.lane.b32.xlu1 %v1020_v18, %s955_s14 }
  0xf6   : > { %v129_v42 = vpop.permute.xlu1 %128 }
  0xf7   : > { %v132_v43 = vmax.f32 %v991_v10, %v129_v42 }
  0xf9   : > { %134 = vrot.lane.b32.xlu0 %v132_v43, %s957_s15 }
  0xfa   : > { %v131_v44 = vpop.permute.xlu1 %130 }
  0xfb   : > { %v133_v45 = vmax.f32 %v1020_v18, %v131_v44 }
  0xfd   : > { %136 = vrot.lane.b32.xlu1 %v133_v45, %s957_s15 }
 0x16b   : > { %v135_v46 = vpop.permute.xlu0 %134 }
 0x16c   : > { %v138_v47 = vmax.f32 %v132_v43, %v135_v46 }
 0x16e   : > { %v210_v48 = vand.u32 255, %v138_v47  ;;  %v291_v49 = vshra.s32 %v138_v47, 8  ;;  %v378_v50 = vshra.s32 %v138_v47, 16  ;;  %v686_v62 = vshrl.u32 %v138_v47, 24 }
 0x16f   : > { %v137_v51 = vpop.permute.xlu1 %136 }
 0x170   : > { %v1290_v52 = vmax.f32 %v133_v45, %v137_v51  ;;  %v212_v53 = vcvt.s32.f32 %v210_v48  ;;  %v293_v54 = vand.u32 255, %v291_v49  ;;  %v380_v55 = vand.u32 255, %v378_v50 }
 0x171   : > { %v469_v0 = vcvt.s32.f32 %v686_v62 }
 0x172   : > { %810 = vmatprep.mubr.f32.mxu0 %v212_v53  ;;  %v295_v56 = vcvt.s32.f32 %v293_v54  ;;  %v211_v57 = vand.u32 255, %v1290_v52  ;;  %v292_v58 = vshra.s32 %v1290_v52, 8  ;;  %v382_v61 = vcvt.s32.f32 %v380_v55 }
 0x173   : > { %v379_v1 = vshra.s32 %v1290_v52, 16  ;;  %v687_v3 = vshrl.u32 %v1290_v52, 24 }
 0x174   : > { %845 = vmatprep.mubr.f32.mxu1 %v295_v56  ;;  %v213_v59 = vcvt.s32.f32 %v211_v57  ;;  %v294_v60 = vand.u32 255, %v292_v58 }
 0x175   : > { %v381_v2 = vand.u32 255, %v379_v1  ;;  %v470_v5 = vcvt.s32.f32 %v687_v3 }
 0x176   : > { %811 = vmatmul.mubr.f32.vlgmr.msra.gmra.mxu0 %v213_v59  ;;  %v296_v63 = vcvt.s32.f32 %v294_v60 }
 0x177   : > { %849 = vmatpush3.msk.msra.mxu0 %vm994_vm0, %v956_v14  ;;  %880 = vmatprep.mubr.f32.mxu0 %v382_v61  ;;  %v383_v4 = vcvt.s32.f32 %v381_v2 }
 0x178   : > { %850 = vmatprep.subr.msk.mxu0 %vm999_vm1, %v956_v14  ;;  %846 = vmatmul.mubr.f32.vlgmr.msra.gmra.mxu1 %v296_v63 }
 0x179   : > { %851 = vmatpush3.msk.msra.mxu0 %vm999_vm1, %v956_v14  ;;  %884 = vmatpush3.msk.msra.mxu1 %vm994_vm0, %v956_v14  ;;  %vm554_vm0 = vcmask 130048  }
 0x17a   : > { %852 = vmatprep.subr.msk.mxu0 %vm1015_vm2, %v956_v14  ;;  %885 = vmatprep.subr.msk.mxu1 %vm999_vm1, %v956_v14 }
 0x17b   : > { %915 = vmatprep.mubr.f32.mxu1 %v469_v0  ;;  %853 = vmatpush3.msk.msra.mxu0 %vm1015_vm2, %v956_v14 }
 0x17c   : > { %886 = vmatpush3.msk.msra.mxu1 %vm999_vm1, %v956_v14  ;;  %854 = vmatprep.subr.msk.mxu0 %vm1035_vm3, %v956_v14 }
 0x17d   : > { %887 = vmatprep.subr.msk.mxu1 %vm1015_vm2, %v956_v14  ;;  %855 = vmatpush3.msk.msra.mxu0 %vm1035_vm3, %v956_v14 }
 0x17e   : > { %888 = vmatpush3.msk.msra.mxu1 %vm1015_vm2, %v956_v14  ;;  %856 = vmatprep.subr.msk.mxu0 %vm1051_vm4, %v956_v14 }
 0x17f   : > { %889 = vmatprep.subr.msk.mxu1 %vm1035_vm3, %v956_v14  ;;  %857 = vmatpush3.msk.msra.mxu0 %vm1051_vm4, %v956_v14 }
 0x180   : > { %890 = vmatpush3.msk.msra.mxu1 %vm1035_vm3, %v956_v14  ;;  %858 = vmatprep.subr.msk.mxu0 %vm1069_vm5, %v956_v14 }
 0x181   : > { %891 = vmatprep.subr.msk.mxu1 %vm1051_vm4, %v956_v14  ;;  %859 = vmatpush3.msk.msra.mxu0 %vm1069_vm5, %v956_v14 }
 0x182   : > { %892 = vmatpush3.msk.msra.mxu1 %vm1051_vm4, %v956_v14  ;;  %860 = vmatprep.subr.msk.mxu0 %vm1087_vm6, %v956_v14 }
 0x183   : > { %893 = vmatprep.subr.msk.mxu1 %vm1069_vm5, %v956_v14  ;;  %861 = vmatpush3.msk.msra.mxu0 %vm1087_vm6, %v956_v14 }
 0x184   : > { %894 = vmatpush3.msk.msra.mxu1 %vm1069_vm5, %v956_v14  ;;  %862 = vmatprep.subr.msk.mxu0 %vm1105_vm7, %v956_v14 }
 0x185   : > { %895 = vmatprep.subr.msk.mxu1 %vm1087_vm6, %v956_v14  ;;  %863 = vmatpush3.msk.msra.mxu0 %vm1105_vm7, %v956_v14 }
 0x186   : > { %896 = vmatpush3.msk.msra.mxu1 %vm1087_vm6, %v956_v14  ;;  %864 = vmatprep.subr.msk.mxu0 %vm1123_vm8, %v956_v14 }
 0x187   : > { %897 = vmatprep.subr.msk.mxu1 %vm1105_vm7, %v956_v14  ;;  %865 = vmatpush3.msk.msra.mxu0 %vm1123_vm8, %v956_v14 }
 0x188   : > { %898 = vmatpush3.msk.msra.mxu1 %vm1105_vm7, %v956_v14  ;;  %866 = vmatprep.subr.msk.mxu0 %vm1141_vm9, %v956_v14 }
 0x189   : > { %899 = vmatprep.subr.msk.mxu1 %vm1123_vm8, %v956_v14  ;;  %867 = vmatpush3.msk.msra.mxu0 %vm1141_vm9, %v956_v14 }
 0x18a   : > { %900 = vmatpush3.msk.msra.mxu1 %vm1123_vm8, %v956_v14  ;;  %868 = vmatprep.subr.msk.mxu0 %vm1159_vm10, %v956_v14 }
 0x18b   : > { %901 = vmatprep.subr.msk.mxu1 %vm1141_vm9, %v956_v14  ;;  %869 = vmatpush3.msk.msra.mxu0 %vm1159_vm10, %v956_v14 }
 0x18c   : > { %902 = vmatpush3.msk.msra.mxu1 %vm1141_vm9, %v956_v14  ;;  %870 = vmatprep.subr.msk.mxu0 %vm1176_vm11, %v956_v14 }
 0x18d   : > { %903 = vmatprep.subr.msk.mxu1 %vm1159_vm10, %v956_v14  ;;  %871 = vmatpush3.msk.msra.mxu0 %vm1176_vm11, %v956_v14 }
 0x18e   : > { %904 = vmatpush3.msk.msra.mxu1 %vm1159_vm10, %v956_v14  ;;  %872 = vmatprep.subr.msk.mxu0 %vm1212_vm12, %v956_v14 }
 0x18f   : > { %905 = vmatprep.subr.msk.mxu1 %vm1176_vm11, %v956_v14  ;;  %873 = vmatpush3.msk.msra.mxu0 %vm1212_vm12, %v956_v14 }
 0x190   : > { %906 = vmatpush3.msk.msra.mxu1 %vm1176_vm11, %v956_v14  ;;  %874 = vmatprep.subr.msk.mxu0 %vm1227_vm13, %v956_v14 }
 0x191   : > { %907 = vmatprep.subr.msk.mxu1 %vm1212_vm12, %v956_v14  ;;  %875 = vmatpush3.msk.msra.mxu0 %vm1227_vm13, %v956_v14 }
 0x192   : > { %908 = vmatpush3.msk.msra.mxu1 %vm1212_vm12, %v956_v14  ;;  %876 = vmatprep.subr.msk.mxu0 %vm1245_vm14, %v956_v14 }
 0x193   : > { %909 = vmatprep.subr.msk.mxu1 %vm1227_vm13, %v956_v14  ;;  %877 = vmatpush3.msk.msra.mxu0 %vm1245_vm14, %v956_v14 }
 0x194   : > { %910 = vmatpush3.msk.msra.mxu1 %vm1227_vm13, %v956_v14  ;;  %878 = vmatprep.subr.msk.mxu0 %vm1263_vm15, %v956_v14 }
 0x195   : > { %911 = vmatprep.subr.msk.mxu1 %vm1245_vm14, %v956_v14  ;;  %879 = vmatpush3.msk.msra.mxu0 %vm1263_vm15, %v956_v14 }
 0x196   : > { %912 = vmatpush3.msk.msra.mxu1 %vm1245_vm14, %v956_v14  ;;  %881 = vmatmul.mubr.f32.vlgmr.msra.gmra.mxu0 %v383_v4 }
 0x197   : > { %913 = vmatprep.subr.msk.mxu1 %vm1263_vm15, %v956_v14 }
 0x198   : > { %914 = vmatpush3.msk.msra.mxu1 %vm1263_vm15, %v956_v14 }
 0x199   : > { %916 = vmatmul.mubr.f32.vlgmr.msra.gmra.mxu1 %v470_v5 }
 0x236   : > { %v812_v8 = vpop.f32.mrf.mxu0 }
 0x237   : > { %v920_v16 = vtrunc.f32 %v812_v8 }
 0x238   : > { %v847_v6 = vpop.f32.mrf.mxu1  ;;  %v280_v11 = vpop.f32.mrf.mxu0 }
 0x239   : > { %v924_v9 = vtrunc.f32 %v847_v6  ;;  %v918_v17 = vtrunc.f32 %v280_v11  ;;  %v921_v25 = vcvt.f32.s32 %v920_v16 }
 0x23a   : > { %v363_v7 = vpop.f32.mrf.mxu1 }
 0x23b   : > { %v922_v10 = vtrunc.f32 %v363_v7  ;;  %v925_v12 = vcvt.f32.s32 %v924_v9  ;;  %v919_v26 = vcvt.f32.s32 %v918_v17 }
 0x23d   : > { %v923_v13 = vcvt.f32.s32 %v922_v10  ;;  %v375_v20 = vshll.u32 %v925_v12, 8 }
 0x23f   : > { %v374_v21 = vshll.u32 %v923_v13, 8  ;;  %v377_v32 = vor.u32 %v921_v25, %v375_v20 }
 0x241   : > { %v376_v33 = vor.u32 %v919_v26, %v374_v21 }
 0x256   : > { %v882_v15 = vpop.f32.mrf.mxu0 }
 0x257   : > { %v928_v18 = vtrunc.f32 %v882_v15 }
 0x258   : > { %v450_v19 = vpop.f32.mrf.mxu0 }
 0x259   : > { %v929_v22 = vcvt.f32.s32 %v928_v18  ;;  %v926_v23 = vtrunc.f32 %v450_v19  ;;  %v917_v24 = vpop.f32.mrf.mxu1 }
 0x25a   : > { %v932_v14 = vtrunc.f32 %v917_v24 }
 0x25b   : > { %v462_v27 = vshll.u32 %v929_v22, 16  ;;  %v927_v28 = vcvt.f32.s32 %v926_v23  ;;  %v537_v29 = vpop.f32.mrf.mxu1 }
 0x25c   : > { %v933_v30 = vcvt.f32.s32 %v932_v14  ;;  %v930_v31 = vtrunc.f32 %v537_v29 }
 0x25d   : > { %v461_v34 = vshll.u32 %v927_v28, 16  ;;  %v464_v36 = vor.u32 %v462_v27, %v377_v32 }
 0x25e   : > { %v931_v35 = vcvt.f32.s32 %v930_v31  ;;  %v549_v38 = vshll.u32 %v933_v30, 24 }
 0x25f   : > { %v463_v37 = vor.u32 %v461_v34, %v376_v33 }
 0x260   : > { %v548_v39 = vshll.u32 %v931_v35, 24  ;;  %v551_v41 = vor.u32 %v549_v38, %v464_v36 }
 0x262   : > { %v550_v40 = vor.u32 %v548_v39, %v463_v37  ;;  %556 = vst.msk [vmem:[%s118_s18 + $0x8] sm:$0xff] %vm554_vm0, %v551_v41 }
 0x264   : > { %555 = vst.msk [vmem:[%s118_s18] sm:$0xff] %vm554_vm0, %v550_v40 }
 0x265 PF: > { %s11_s6 = sadd.s32 1, %s952_s6  }
 0x266   : > { %p8_p4 = scmp.ge.s32.totalorder %s11_s6, 6  }
 0x268   :  { %10 = sbr.rel (!%p8_p4) target bundleno = 1 (0x1), region = 54 }

</bundles_post_ra>
